<compile_context>
chip_gen: v7x
topology: tpu7x:2x2x1
jax: 0.10.0
libtpu: 0.0.40
codegen_flags: <defaults>
</compile_context>

<pallas_src>
import jax
import jax.numpy as jnp
from jax.experimental import pallas as pl
from jax.experimental.pallas import tpu as pltpu


def _round_up(x, m):
    return (x + m - 1) // m * m


def _embed_kernel(patch_ref, w_ref, b_ref, pos_ref, out_ref):
    # patch_ref: (TM, Dp_pad)    flattened image patches (bf16 / f32)
    # w_ref:     (Dp_pad, E_pad) conv weight reshaped+transposed (bf16 / f32)
    # b_ref:     (1, E_pad)      conv bias (f32)
    # pos_ref:   (TM, E_pad)     position tokens for patch tokens (bf16 / f32)
    # out_ref:   (TM, E_pad)     f32
    proj = jnp.dot(patch_ref[...], w_ref[...],
                   preferred_element_type=jnp.float32)          # MXU, f32 accum
    # Epilogue in f32 (cheap on the VPU; correct on v5e which lacks bf16 VPU).
    out_ref[...] = (proj + b_ref[...]
                    + pos_ref[...].astype(jnp.float32)).astype(out_ref.dtype)


def embeding_forward(x, conv_w, conv_b, class_tokens, position_tokens,
                     patch_size, *, matmul_dtype=jnp.bfloat16,
                     out_dtype=jnp.float32):
    """x: (B, 3, H, W) float32. Returns (B, N+1, E) `out_dtype` (eval mode)."""
    B, C, H, W = x.shape
    P = patch_size
    nH, nW = H // P, W // P
    N = nH * nW
    E = conv_w.shape[0]
    Dp = C * P * P
    M = B * N

    # --- glue: extract non-overlapping patches ordered (c, kh, kw) to match
    # the flattened PyTorch Conv2d weight (out, in, kh, kw); flatten batch and
    # token axes so the kernel sees one big (M, Dp) x (Dp, E) matmul.
    patches = x.reshape(B, C, nH, P, nW, P)
    patches = patches.transpose(0, 2, 4, 1, 3, 5).reshape(M, Dp)
    w_mat = conv_w.reshape(E, Dp).T                              # (Dp, E)

    # --- pad to vreg/MXU friendly shapes.
    #   lanes (E): multiple of 128; single lane tile TE = E_pad (weight fetched
    #   exactly once, one wide lane-dense output store).
    #   K (Dp):    multiple of 128 so the MXU K pass / patch vlds are unmasked.
    #   rows (M):  tile of up to 512, multiple of 16 (bf16 packs 16 rows/vreg).
    E_pad = _round_up(E, 128)
    TE = E_pad
    Dp_pad = _round_up(Dp, 128)
    TM = min(512, _round_up(M, 16))        # 512 keeps v7x (64 MiB VMEM) safe
    M_pad = _round_up(M, TM)
    num_m = M_pad // TM                    # "parallel" -> shards over v7x TCs

    patches_p = jnp.pad(
        patches, ((0, M_pad - M), (0, Dp_pad - Dp))).astype(matmul_dtype)
    w_p = jnp.pad(
        w_mat, ((0, Dp_pad - Dp), (0, E_pad - E))).astype(matmul_dtype)
    b_p = jnp.pad(conv_b.reshape(1, E),
                  ((0, 0), (0, E_pad - E))).astype(jnp.float32)
    pos_body = position_tokens[:, 1:, :].reshape(M, E)
    pos_p = jnp.pad(pos_body,
                    ((0, M_pad - M), (0, E_pad - E))).astype(matmul_dtype)

    mm_item = jnp.dtype(matmul_dtype).itemsize
    out_item = jnp.dtype(out_dtype).itemsize
    cost = pl.CostEstimate(
        flops=2 * M_pad * Dp_pad * E_pad,
        transcendentals=0,
        bytes_accessed=(patches_p.size * mm_item        # patches, streamed once
                        + w_p.size * mm_item            # weight, fetched once
                        + b_p.size * 4
                        + pos_p.size * mm_item          # pos, streamed once
                        + M_pad * E_pad * out_item))    # output

    body = pl.pallas_call(
        _embed_kernel,
        out_shape=jax.ShapeDtypeStruct((M_pad, E_pad), out_dtype),
        grid_spec=pltpu.PrefetchScalarGridSpec(
            num_scalar_prefetch=0,
            grid=(num_m,),
            in_specs=[
                pl.BlockSpec((TM, Dp_pad), lambda i: (i, 0)),    # patches
                pl.BlockSpec((Dp_pad, TE), lambda i: (0, 0)),    # weight (once)
                pl.BlockSpec((1, TE), lambda i: (0, 0)),         # bias
                pl.BlockSpec((TM, TE), lambda i: (i, 0)),        # pos tokens
            ],
            out_specs=pl.BlockSpec((TM, TE), lambda i: (i, 0)),
        ),
        compiler_params=pltpu.CompilerParams(
            dimension_semantics=("parallel",),
            vmem_limit_bytes=64 * 1024 * 1024,
            # Let XLA fuse the transpose/pad/cast producers into the operands
            # instead of materializing padded copies in HBM first.
            allow_input_fusion=[True, True, True, True]),
        cost_estimate=cost,
    )(patches_p, w_p, b_p, pos_p)

    body = body[:M, :E].astype(jnp.float32).reshape(B, N, E)

    # Token 0 (class token + its position token): tiny BxE op done in XLA so
    # the kernel keeps a single aligned, lane-dense store.
    cls_row = class_tokens + position_tokens[:, :1, :]
    out = jnp.concatenate([cls_row, body], axis=1).astype(out_dtype)
    # TODO(synk): nn.Dropout(p) is identity in eval mode; training-mode
    # stochastic dropout (pltpu.prng_*) is not implemented here.
    return out


def reference_forward(x, conv_w, conv_b, class_tokens, position_tokens,
                      patch_size):
    """Pure-JAX reference mirroring the PyTorch forward (eval mode)."""
    p = jax.lax.conv_general_dilated(
        x, conv_w, window_strides=(patch_size, patch_size), padding="VALID",
        dimension_numbers=("NCHW", "OIHW", "NCHW"))
    p = p + conv_b[None, :, None, None]
    B, E, nH, nW = p.shape
    p = p.reshape(B, E, nH * nW).transpose(0, 2, 1)       # (B, N, E)
    p = jnp.concatenate([class_tokens, p], axis=1)
    p = p + position_tokens
    return p


if __name__ == "__main__":
    # Small shapes consistent with the module:
    # image_size=(16,16), patch_size=8 -> N = 4 patches, embed_dim=32, batch=2
    B, C, H, W = 2, 3, 16, 16
    P = 8
    E = 32
    N = (H // P) * (W // P)

    key = jax.random.PRNGKey(0)
    k1, k2, k3 = jax.random.split(key, 3)
    x = jax.random.normal(k1, (B, C, H, W), dtype=jnp.float32)
    conv_w = jax.random.normal(k2, (E, C, P, P), dtype=jnp.float32) * 0.02
    conv_b = jax.random.normal(k3, (E,), dtype=jnp.float32) * 0.02
    # PyTorch module initializes these to ones (per-batch parameters).
    class_tokens = jnp.ones((B, 1, E), dtype=jnp.float32)
    position_tokens = jnp.ones((B, N + 1, E), dtype=jnp.float32)

    ref = reference_forward(x, conv_w, conv_b, class_tokens,
                            position_tokens, P)

    # f32 matmul path: tight correctness check.
    out_f32 = embeding_forward(x, conv_w, conv_b, class_tokens,
                               position_tokens, P, matmul_dtype=jnp.float32)
    out_f32 = jax.block_until_ready(out_f32)
    assert out_f32.shape == (B, N + 1, E), out_f32.shape
    assert jnp.allclose(out_f32, ref, atol=1e-4, rtol=1e-4), \
        float(jnp.max(jnp.abs(out_f32 - ref)))

    # Default bf16-fed MXU path (fast path on v5e/v6e/v7x): looser tolerance.
    out_bf16 = embeding_forward(x, conv_w, conv_b, class_tokens,
                                position_tokens, P)
    out_bf16 = jax.block_until_ready(out_bf16)
    assert out_bf16.shape == (B, N + 1, E), out_bf16.shape
    assert jnp.allclose(out_bf16, ref, atol=5e-2, rtol=5e-2), \
        float(jnp.max(jnp.abs(out_bf16 - ref)))

    print("KERNEL_OK")
</pallas_src>

<mosaic_0001>
module attributes {stable_mosaic.version = 11 : i64} {
  func.func @_embed_kernel(%arg0: i32, %arg1: memref<16x256xf32, #tpu.memory_space<vmem>>, %arg2: memref<256x128xf32, #tpu.memory_space<vmem>>, %arg3: memref<1x128xf32, #tpu.memory_space<vmem>>, %arg4: memref<16x128xf32, #tpu.memory_space<vmem>>, %arg5: memref<16x128xf32, #tpu.memory_space<vmem>>) attributes {dimension_semantics = [#tpu.dimension_semantics<parallel>], iteration_bounds = array<i64: 1>, scalar_prefetch = 0 : i64, scratch_operands = 0 : i64, tpu.core_type = #tpu.core_type<tc>, window_params = [{transform_indices = @transform_0, window_bounds = array<i64: 16, 256>}, {pipeline_mode = #tpu.pipeline_mode<synchronous>, transform_indices = @transform_1, window_bounds = array<i64: 256, 128>}, {pipeline_mode = #tpu.pipeline_mode<synchronous>, transform_indices = @transform_2, window_bounds = array<i64: 1, 128>}, {transform_indices = @transform_3, window_bounds = array<i64: 16, 128>}, {transform_indices = @transform_4, window_bounds = array<i64: 16, 128>}]} {
    %c0 = arith.constant 0 : index
    %c0_0 = arith.constant 0 : index
    %0 = vector.load %arg1[%c0, %c0_0] : memref<16x256xf32, #tpu.memory_space<vmem>>, vector<16x256xf32>
    %c0_1 = arith.constant 0 : index
    %c0_2 = arith.constant 0 : index
    %1 = vector.load %arg2[%c0_1, %c0_2] : memref<256x128xf32, #tpu.memory_space<vmem>>, vector<256x128xf32>
    %cst = arith.constant dense<0.000000e+00> : vector<16x128xf32>
    %2 = tpu.matmul %0, %1, %cst {dimension_numbers = #tpu.dot_dimension_numbers<[1], [0], [0], [1], [0, 0, 1, 1], [], []>} : vector<16x256xf32>, vector<256x128xf32>, vector<16x128xf32> -> vector<16x128xf32>
    %c0_3 = arith.constant 0 : index
    %c0_4 = arith.constant 0 : index
    %3 = vector.load %arg3[%c0_3, %c0_4] : memref<1x128xf32, #tpu.memory_space<vmem>>, vector<1x128xf32>
    %4 = vector.broadcast %3 : vector<1x128xf32> to vector<16x128xf32>
    %5 = arith.addf %2, %4 : vector<16x128xf32>
    %c0_5 = arith.constant 0 : index
    %c0_6 = arith.constant 0 : index
    %6 = vector.load %arg4[%c0_5, %c0_6] : memref<16x128xf32, #tpu.memory_space<vmem>>, vector<16x128xf32>
    %7 = arith.addf %5, %6 : vector<16x128xf32>
    %c0_7 = arith.constant 0 : index
    %c0_8 = arith.constant 0 : index
    %8 = vector.load %arg5[%c0_7, %c0_8] : memref<16x128xf32, #tpu.memory_space<vmem>>, vector<16x128xf32>
    tpu.vector_store %arg5[%c0_7, %c0_8], %7 {strides = array<i32>} : memref<16x128xf32, #tpu.memory_space<vmem>>, vector<16x128xf32>,
    return
  }
  func.func @transform_0(%arg0: i32) -> (i32, i32) {
    %c0_i32 = arith.constant 0 : i32
    %c0_i32_0 = arith.constant 0 : i32
    return %arg0, %c0_i32 : i32, i32
  }
  func.func @transform_1(%arg0: i32) -> (i32, i32) {
    %c0_i32 = arith.constant 0 : i32
    %c0_i32_0 = arith.constant 0 : i32
    %c0_i32_1 = arith.constant 0 : i32
    return %c0_i32, %c0_i32_0 : i32, i32
  }
  func.func @transform_2(%arg0: i32) -> (i32, i32) {
    %c0_i32 = arith.constant 0 : i32
    %c0_i32_0 = arith.constant 0 : i32
    %c0_i32_1 = arith.constant 0 : i32
    return %c0_i32, %c0_i32_0 : i32, i32
  }
  func.func @transform_3(%arg0: i32) -> (i32, i32) {
    %c0_i32 = arith.constant 0 : i32
    %c0_i32_0 = arith.constant 0 : i32
    return %arg0, %c0_i32 : i32, i32
  }
  func.func @transform_4(%arg0: i32) -> (i32, i32) {
    %c0_i32 = arith.constant 0 : i32
    %c0_i32_0 = arith.constant 0 : i32
    return %arg0, %c0_i32 : i32, i32
  }
}

</mosaic_0001>

<bundles_post_ra>
// kernel: tpu_custom_call.1
= control target key start
LH: loop header
LB: loop body
LE: loop exit
PB: predicated region body
PF: predicated region fallthrough
CT: control target
= control target key end

     0   :  { %9 = vsyncpa [#allocation3], 0  ;;  %s538_s0 = inlined_call_operand.hbm [shape: f32[16,256], index: 0, kind: input, shape index: {}]   ;;  %s539_s1 = inlined_call_operand.hbm [shape: f32[256,128], index: 1, kind: input, shape index: {}]   ;;  %s540_s2 = inlined_call_operand.hbm [shape: f32[1,128], index: 2, kind: input, shape index: {}]   ;;  %s541_s3 = inlined_call_operand.hbm [shape: f32[16,128], index: 3, kind: input, shape index: {}]   ;;  %s542_s4 = inlined_call_operand.hbm [shape: f32[16,128], index: 4, kind: output, shape index: {}]  }
   0x1   :  { %10 = vsyncpa [#allocation6], 0 }
   0x2   :  { %11 = vsyncpa [#allocation9], 0 }
   0x3   :  { %12 = vsyncpa [#allocation4], 0  ;;  %s428_s15 = smov [#allocation5]   ;;  %s310_s19 = scalar_lea.hbm %s539_s1, 4096 }
   0x4   :  { %s30_s16 = sshll.u32 %s428_s15, 4  ;;  %p311_p0 = scmp.ne.s32.totalorder %s539_s1, %s310_s19  ;;  %s31_s16 = int_to_ptr.vmem [resolvable:$true] %s30_s16 }
   0x5   :  { %p314_p1 = scmp.lt.u32.totalorder %s310_s19, %s539_s1 }
   0x7   :  { %p316_p2 = pnand %p314_p1, %p311_p0 }
   0x9   :  { %319 = shalt.err (!%p316_p2)
}
   0xa   :  { %s320_s24 = scalar_lea.vmem %s31_s16, 4096  ;;  %p325_p4 = scmp.lt.s32.totalorder %s31_s16, %s31_s16 }
   0xb   :  { %p321_p3 = scmp.ne.s32.totalorder %s31_s16, %s320_s24  ;;  %p326_p5 = scmp.lt.s32.totalorder %s320_s24, %s320_s24 }
   0xd   :  { %p327_p6 = por %p326_p5, %p325_p4 }
   0xf   :  { %p328_p7 = pnand %p327_p6, %p321_p3 }
  0x11   :  { %331 = shalt.err (!%p328_p7)
}
  0x12   :  { %s429_s25 = smov 128   ;;  %s430_s26 = smov 8  }
  0x13   :  { %36 = dma.hbm_to_vmem [thread:$0]  %s539_s1, 4096, %s31_s16, [#allocation6], %s429_s25, %s429_s25, %s430_s26  }
  0x14   :  { %s431_s29 = smov [#allocation2]   ;;  %s332_s7 = scalar_lea.hbm %s538_s0, 512 }
  0x15   :  { %s18_s30 = sshll.u32 %s431_s29, 4  ;;  %p333_p8 = scmp.ne.s32.totalorder %s538_s0, %s332_s7  ;;  %s19_s30 = int_to_ptr.vmem [resolvable:$true] %s18_s30 }
  0x16   :  { %p336_p9 = scmp.lt.u32.totalorder %s332_s7, %s538_s0 }
  0x18   :  { %p338_p10 = pnand %p336_p9, %p333_p8 }
  0x1a   :  { %341 = shalt.err (!%p338_p10)
}
  0x1b   :  { %s342_s12 = scalar_lea.vmem %s19_s30, 512  ;;  %p347_p12 = scmp.lt.s32.totalorder %s19_s30, %s19_s30 }
  0x1c   :  { %p343_p11 = scmp.ne.s32.totalorder %s19_s30, %s342_s12  ;;  %p348_p13 = scmp.lt.s32.totalorder %s342_s12, %s342_s12 }
  0x1e   :  { %p349_p0 = por %p348_p13, %p347_p12 }
  0x20   :  { %p350_p1 = pnand %p349_p0, %p343_p11 }
  0x22   :  { %353 = shalt.err (!%p350_p1)
}
  0x23   :  { %s432_s1 = smov 256   ;;  %s433_s13 = smov 16  }
  0x24   :  { %24 = dma.hbm_to_vmem [thread:$0]  %s538_s0, 512, %s19_s30, [#allocation3], %s432_s1, %s432_s1, %s433_s13  }
  0x25   :  { %s434_s16 = smov [#allocation7]   ;;  %s435_s18 = smov [#allocation8]  }
  0x26   :  { %s43_s17 = sshll.u32 %s434_s16, 4  ;;  %s52_s19 = sshll.u32 %s435_s18, 4  ;;  %s44_s17 = int_to_ptr.vmem [resolvable:$true] %s43_s17  ;;  %s489_s19 = int_to_ptr.vmem [resolvable:$true] %s52_s19 }
  0x27   :  { %s354_s22 = scalar_lea.hbm %s540_s2, 16 }
  0x28   :  { %p355_p2 = scmp.ne.s32.totalorder %s540_s2, %s354_s22  ;;  %p358_p3 = scmp.lt.u32.totalorder %s354_s22, %s540_s2 }
  0x2a   :  { %p360_p4 = pnand %p358_p3, %p355_p2 }
  0x2c   :  { %363 = shalt.err (!%p360_p4)
}
  0x2d   :  { %s364_s0 = scalar_lea.vmem %s44_s17, 16  ;;  %s368_s29 = scalar_lea.vmem %s44_s17, 32 }
  0x2e   :  { %p365_p5 = scmp.ne.s32.totalorder %s44_s17, %s364_s0  ;;  %p369_p6 = scmp.lt.s32.totalorder %s44_s17, %s44_s17 }
  0x2f   :  { %p370_p7 = scmp.lt.s32.totalorder %s368_s29, %s364_s0 }
  0x31   :  { %p371_p8 = por %p370_p7, %p369_p6 }
  0x33   :  { %p372_p9 = pnand %p371_p8, %p365_p5 }
  0x35   :  { %375 = shalt.err (!%p372_p9)
}
  0x36   :  { %46 = dma.hbm_to_vmem [thread:$0]  %s540_s2, 16, %s44_s17, [#allocation6]  }
  0x37   :  { %s376_s8 = scalar_lea.hbm %s541_s3, 256 }
  0x38   :  { %p377_p10 = scmp.ne.s32.totalorder %s541_s3, %s376_s8  ;;  %p380_p11 = scmp.lt.u32.totalorder %s376_s8, %s541_s3 }
  0x3a   :  { %p382_p12 = pnand %p380_p11, %p377_p10 }
  0x3c   :  { %385 = shalt.err (!%p382_p12)
}
  0x3d   :  { %s386_s1 = scalar_lea.vmem %s489_s19, 256  ;;  %p391_p0 = scmp.lt.s32.totalorder %s489_s19, %s489_s19 }
  0x3e   :  { %p387_p13 = scmp.ne.s32.totalorder %s489_s19, %s386_s1  ;;  %p392_p1 = scmp.lt.s32.totalorder %s386_s1, %s386_s1 }
  0x40   :  { %p393_p2 = por %p392_p1, %p391_p0 }
  0x42   :  { %p394_p3 = pnand %p393_p2, %p387_p13 }
  0x44   :  { %397 = shalt.err (!%p394_p3)
}
  0x45   :  { %58 = dma.hbm_to_vmem [thread:$0]  %s541_s3, 256, %s489_s19, [#allocation9], %s429_s25, %s429_s25, %s430_s26  }
  0x46   :  { %420 = dma.done.wait [#allocation3], 512  }
  0x47   :  { %421 = vsyncadd [#allocation3], 4294966784 }
  0x48   :  { %422 = dma.done.wait [#allocation6], 4112  }
  0x49   :  { %423 = vsyncadd [#allocation6], 4294963184 }
  0x4a   :  { %424 = dma.done.wait [#allocation9], 256  }
  0x4b   :  { %425 = vsyncadd [#allocation9], 4294967040  ;;  %v91_v0 = vld [vmem:[#allocation5 + $0x80] sm:$0xff]  ;;  %v92_v1 = vld [vmem:[#allocation5 + $0x88] sm:$0xff]  ;;  %s436_s3 = smov [#allocation10]  }
  0x4c   :  { %v75_v2 = vld [vmem:[#allocation5] sm:$0xff]  ;;  %v253_v3 = vpack.c.bf16 %v92_v1, %v91_v0  ;;  %v76_v4 = vld [vmem:[#allocation5 + $0x8] sm:$0xff]  ;;  %v93_v5 = vld [vmem:[#allocation5 + $0x90] sm:$0xff]  ;;  %s200_s14 = sshll.u32 %s436_s3, 4  ;;  %s201_s14 = int_to_ptr.vmem [resolvable:$true] %s200_s14 }
  0x4d   :  { %v94_v6 = vld [vmem:[#allocation5 + $0x98] sm:$0xff]  ;;  %v255_v7 = vpack.c.bf16 %v76_v4, %v75_v2  ;;  %v77_v9 = vld [vmem:[#allocation5 + $0x10] sm:$0xff]  ;;  %v95_v11 = vld [vmem:[#allocation5 + $0xa0] sm:$0xff]  ;;  %s398_s15 = scalar_lea.vmem %s201_s14, 256  ;;  %p403_p5 = scmp.lt.s32.totalorder %s201_s14, %s201_s14 }
  0x4e   :  { %v257_v8 = vpack.c.bf16 %v94_v6, %v93_v5  ;;  %v78_v10 = vld [vmem:[#allocation5 + $0x18] sm:$0xff]  ;;  %254 = vmatprep.subr.bf16.mxu0 %v253_v3  ;;  %285 = vmatprep.subr.bf16.mxu1 %v253_v3  ;;  %v96_v12 = vld [vmem:[#allocation5 + $0xa8] sm:$0xff]  ;;  %v79_v15 = vld [vmem:[#allocation5 + $0x20] sm:$0xff]  ;;  %p399_p4 = scmp.ne.s32.totalorder %s201_s14, %s398_s15  ;;  %p404_p6 = scmp.lt.s32.totalorder %s398_s15, %s398_s15 }
  0x4f   :  { %256 = vmatpush3.bf16.msra.mxu0 %v255_v7  ;;  %293 = vmatpush3.bf16.msra.mxu1 %v255_v7  ;;  %v259_v13 = vpack.c.bf16 %v78_v10, %v77_v9  ;;  %v261_v14 = vpack.c.bf16 %v96_v12, %v95_v11  ;;  %v80_v16 = vld [vmem:[#allocation5 + $0x28] sm:$0xff]  ;;  %v97_v17 = vld [vmem:[#allocation5 + $0xb0] sm:$0xff]  ;;  %v98_v18 = vld [vmem:[#allocation5 + $0xb8] sm:$0xff] }
  0x50   :  { %258 = vmatprep.subr.bf16.mxu0 %v257_v8  ;;  %286 = vmatprep.subr.bf16.mxu1 %v257_v8  ;;  %v263_v19 = vpack.c.bf16 %v80_v16, %v79_v15  ;;  %v265_v20 = vpack.c.bf16 %v98_v18, %v97_v17  ;;  %v81_v21 = vld [vmem:[#allocation5 + $0x30] sm:$0xff]  ;;  %v82_v22 = vld [vmem:[#allocation5 + $0x38] sm:$0xff]  ;;  %v99_v23 = vld [vmem:[#allocation5 + $0xc0] sm:$0xff]  ;;  %p405_p7 = por %p404_p6, %p403_p5 }
  0x51   :  { %v100_v24 = vld [vmem:[#allocation5 + $0xc8] sm:$0xff]  ;;  %v74_v26 = vld [vmem:[#allocation2 + $0x18] sm:$0xff]  ;;  %v267_v27 = vpack.c.bf16 %v82_v22, %v81_v21  ;;  %v83_v29 = vld [vmem:[#allocation5 + $0x40] sm:$0xff] }
  0x52   :  { %v72_v25 = vld [vmem:[#allocation2 + $0x8] sm:$0xff]  ;;  %v269_v28 = vpack.c.bf16 %v100_v24, %v99_v23  ;;  %v101_v31 = vld [vmem:[#allocation5 + $0xd0] sm:$0xff]  ;;  %v102_v32 = vld [vmem:[#allocation5 + $0xd8] sm:$0xff]  ;;  %183 = vmatprep.mubr.f32.mxu1 %v74_v26  ;;  %p406_p8 = pnand %p405_p7, %p399_p4 }
  0x53   :  { %260 = vmatpush3.bf16.msra.mxu0 %v259_v13  ;;  %294 = vmatpush3.bf16.msra.mxu1 %v259_v13  ;;  %v84_v30 = vld [vmem:[#allocation5 + $0x48] sm:$0xff]  ;;  %v273_v34 = vpack.c.bf16 %v102_v32, %v101_v31  ;;  %v85_v35 = vld [vmem:[#allocation5 + $0x50] sm:$0xff]  ;;  %v86_v36 = vld [vmem:[#allocation5 + $0x58] sm:$0xff] }
  0x54   :  { %262 = vmatprep.subr.bf16.mxu0 %v261_v14  ;;  %287 = vmatprep.subr.bf16.mxu1 %v261_v14  ;;  %v271_v33 = vpack.c.bf16 %v84_v30, %v83_v29  ;;  %v103_v37 = vld [vmem:[#allocation5 + $0xe0] sm:$0xff]  ;;  %v104_v38 = vld [vmem:[#allocation5 + $0xe8] sm:$0xff]  ;;  %v275_v39 = vpack.c.bf16 %v86_v36, %v85_v35  ;;  %v105_v43 = vld [vmem:[#allocation5 + $0xf0] sm:$0xff] }
  0x55   :  { %178 = vmatprep.mubr.f32.mxu0 %v72_v25  ;;  %v277_v40 = vpack.c.bf16 %v104_v38, %v103_v37  ;;  %v87_v41 = vld [vmem:[#allocation5 + $0x60] sm:$0xff]  ;;  %v88_v42 = vld [vmem:[#allocation5 + $0x68] sm:$0xff]  ;;  %v106_v44 = vld [vmem:[#allocation5 + $0xf8] sm:$0xff] }
  0x56   :  { %v279_v45 = vpack.c.bf16 %v88_v42, %v87_v41  ;;  %v281_v46 = vpack.c.bf16 %v106_v44, %v105_v43  ;;  %v89_v47 = vld [vmem:[#allocation5 + $0x70] sm:$0xff]  ;;  %v90_v48 = vld [vmem:[#allocation5 + $0x78] sm:$0xff]  ;;  %v71_v50 = vld [vmem:[#allocation2] sm:$0xff] }
  0x57   :  { %264 = vmatpush3.bf16.msra.mxu0 %v263_v19  ;;  %295 = vmatpush3.bf16.msra.mxu1 %v263_v19  ;;  %v283_v49 = vpack.c.bf16 %v90_v48, %v89_v47  ;;  %v73_v51 = vld [vmem:[#allocation2 + $0x10] sm:$0xff]  ;;  %v214_v54 = vld [vmem:[#allocation7] ss:$0 sm:$0xff]  ;;  %v189_v59 = vld [vmem:[#allocation8] sm:$0xff] }
  0x58   :  { %266 = vmatprep.subr.bf16.mxu0 %v265_v20  ;;  %288 = vmatprep.subr.bf16.mxu1 %v265_v20  ;;  %v190_v60 = vld [vmem:[#allocation8 + $0x8] sm:$0xff] }
  0x5b   :  { %268 = vmatpush3.bf16.msra.mxu0 %v267_v27  ;;  %296 = vmatpush3.bf16.msra.mxu1 %v267_v27 }
  0x5c   :  { %270 = vmatprep.subr.bf16.mxu0 %v269_v28  ;;  %289 = vmatprep.subr.bf16.mxu1 %v269_v28 }
  0x5f   :  { %272 = vmatpush3.bf16.msra.mxu0 %v271_v33  ;;  %297 = vmatpush3.bf16.msra.mxu1 %v271_v33 }
  0x60   :  { %274 = vmatprep.subr.bf16.mxu0 %v273_v34  ;;  %290 = vmatprep.subr.bf16.mxu1 %v273_v34 }
  0x63   :  { %276 = vmatpush3.bf16.msra.mxu0 %v275_v39  ;;  %298 = vmatpush3.bf16.msra.mxu1 %v275_v39 }
  0x64   :  { %278 = vmatprep.subr.bf16.mxu0 %v277_v40  ;;  %291 = vmatprep.subr.bf16.mxu1 %v277_v40 }
  0x67   :  { %280 = vmatpush3.bf16.msra.mxu0 %v279_v45  ;;  %299 = vmatpush3.bf16.msra.mxu1 %v279_v45 }
  0x68   :  { %282 = vmatprep.subr.bf16.mxu0 %v281_v46  ;;  %292 = vmatprep.subr.bf16.mxu1 %v281_v46 }
  0x6b   :  { %284 = vmatpush3.bf16.msra.mxu0 %v283_v49  ;;  %300 = vmatpush3.bf16.msra.mxu1 %v283_v49 }
  0x6e   :  { %179 = vmatmul.mubr.f32.vlgmr.msra.gmra.mrb[0].mxu0 %v71_v50  ;;  %184 = vmatmul.mubr.f32.vlgmr.msra.gmra.mrb[0].mxu1 %v73_v51 }
 0x141   :  { %v247_v52 = vpop.f32.mrb[0].mxu0  ;;  %v250_v53 = vpop.f32.mrb[0].mxu1 }
 0x142   :  { %v248_v55 = vpop.f32.mrb[1].mxu0  ;;  %v251_v56 = vpop.f32.mrb[1].mxu1 }
 0x143   :  { %v249_v57 = vadd.f32 %v248_v55, %v247_v52  ;;  %v252_v58 = vadd.f32 %v251_v56, %v250_v53 }
 0x145   :  { %v181_v61 = vadd.f32 %v249_v57, %v214_v54  ;;  %v186_v62 = vadd.f32 %v252_v58, %v214_v54 }
 0x147   :  { %v191_v63 = vadd.f32 %v189_v59, %v181_v61  ;;  %v192_v0 = vadd.f32 %v190_v60, %v186_v62 }
 0x149   :  { %193 = vst [vmem:[#allocation10] sm:$0xff] %v191_v63  ;;  %194 = vst [vmem:[#allocation10 + $0x8] sm:$0xff] %v192_v0 }
 0x14a   :  { %409 = shalt.err (!%p406_p8)
}
 0x14b   :  { %s410_s18 = scalar_lea.hbm %s542_s4, 256 }
 0x14c   :  { %p411_p9 = scmp.ne.s32.totalorder %s542_s4, %s410_s18  ;;  %p414_p10 = scmp.lt.u32.totalorder %s410_s18, %s542_s4 }
 0x14e   :  { %p416_p11 = pnand %p414_p10, %p411_p9 }
 0x150   :  { %419 = shalt.err (!%p416_p11)
}
 0x151   :  { %206 = dma.vmem_to_hbm [thread:$0]  %s201_s14, 256, %s542_s4, [#allocation4], %s429_s25, %s429_s25, %s430_s26  }
 0x152   :  { %426 = dma.done.wait [#allocation4], 256  }
 0x153   :  { %427 = vsyncadd [#allocation4], 4294967040 }
 0x154   :  { %210 = vsyncpa [#allocation3], 1 }
 0x155   :  { %211 = vsyncpa [#allocation6], 1 }
 0x156   :  { %212 = vsyncpa [#allocation9], 1 }
 0x157   :  { %213 = vsyncpa [#allocation4], 1 }

</bundles_post_ra>
